<compile_context>
chip_gen: v5e
topology: v5e:2x2
jax: 0.10.0
libtpu: 0.0.40
codegen_flags: <defaults>
</compile_context>

<pallas_src>
import math

import jax
import jax.numpy as jnp
from jax.experimental import pallas as pl
from jax.experimental.pallas import tpu as pltpu


# ---------------------------------------------------------------------------
# helpers
# ---------------------------------------------------------------------------
def _round_up(n, m):
    return ((n + m - 1) // m) * m


def _cdiv(a, b):
    return -(-a // b)


def _pow2_floor(n):
    p = 1
    while p * 2 <= n:
        p *= 2
    return p


def _vmem_capacity_bytes():
    """Generation-aware VMEM capacity (128 MiB v5e/v6e, 64 MiB per TC v7x)."""
    try:
        return int(pltpu.get_tpu_info().vmem_capacity_bytes)
    except Exception:
        return 64 << 20  # most conservative (v7x per-TensorCore VMEM)


def _compiler_params(dim_sems, vmem_bytes_estimate, vmem_cap):
    kwargs = dict(dimension_semantics=dim_sems)
    if vmem_bytes_estimate > (12 << 20):
        # Raise the scoped-VMEM limit past conservative defaults (16 MiB v5e,
        # 32 MiB v6e/v7x) but stay <= 3/4 of physical VMEM (48 MiB on v7x).
        limit = int(min(max(vmem_bytes_estimate + (8 << 20), 32 << 20),
                        (vmem_cap * 3) // 4))
        kwargs["vmem_limit_bytes"] = limit
    return pltpu.CompilerParams(**kwargs)


def _choose_token_tile(n_tokens, per_token_bytes, requested, budget_bytes):
    """Token tile: multiple of 16, big enough to amortize per-step overhead,
    small enough to fit the per-generation VMEM budget, and capped so a
    'parallel' token axis has >= 2 steps (v7x dual TensorCore; neutral on
    single-core v5e/v6e)."""
    t = min(requested, _round_up(n_tokens, 16))
    t = min(t, max(16, budget_bytes // max(per_token_bytes, 1)))
    if n_tokens > 16:
        t = min(t, _round_up((n_tokens + 1) // 2, 16))
    return max(16, (t // 16) * 16)


# ---------------------------------------------------------------------------
# kernels
# ---------------------------------------------------------------------------
def _make_onehot_kernel(vocab_p, scale, precision):
    """VMEM-resident table, gather = one-hot matmul on the MXU."""

    def kernel(ids_ref, lut_ref, out_ref):
        # ids_ref: (T, 1) int32   lut_ref: (vocab_p, dm_p)   out_ref: (T, dm_p)
        ids = ids_ref[...]                                              # (T, 1)
        cols = jax.lax.broadcasted_iota(jnp.int32, (ids.shape[0], vocab_p), 1)
        onehot = (ids == cols).astype(lut_ref.dtype)                    # (T, V)
        gathered = jnp.dot(onehot, lut_ref[...],
                           precision=precision,
                           preferred_element_type=jnp.float32)          # (T, D)
        # sqrt(d_model) scale stays in-kernel (rides the otherwise idle VPU).
        out_ref[...] = (gathered * scale).astype(out_ref.dtype)

    return kernel


_UNROLL = 4  # row-loop unroll: lets the LLO co-issue adjacent DMA descriptors


def _make_dma_gather_kernel(tile, k, tiles_per_split, scale, lut_dtype):
    """HBM table, per-row gather DMAs with k in flight, unrolled loops and
    cross-tile double buffering of both the row buffer and the semaphores."""
    bf16_epilogue = jnp.dtype(lut_dtype) == jnp.dtype(jnp.bfloat16)

    def kernel(ids_ref, lut_hbm, out_ref, rowbuf, sems):
        # ids_ref : SMEM (n_pad+tile,) int32   lut_hbm : HBM (vocab_p, dm_p)
        # out_ref : VMEM (tile, dm_p)          rowbuf  : VMEM (2*tile, dm_p)
        # sems    : DMA semaphores (2*k,)
        o = pl.program_id(0)                 # 'parallel' split (megacore)
        i = pl.program_id(1)                 # sequential tiles within split
        base = (o * tiles_per_split + i) * tile
        slot = i % 2                         # cross-tile double-buffer bank
        nslot = 1 - slot

        def start_row(bank, t, tok):
            pltpu.make_async_copy(
                lut_hbm.at[pl.ds(tok, 1), :],
                rowbuf.at[pl.ds(bank * tile + t, 1), :],
                sems.at[bank * k + (t & (k - 1))],
            ).start()

        def wait_row(bank, t):
            # Every gather moves exactly one table row; src/dst here only set
            # the byte count for the semaphore wait.
            pltpu.make_async_copy(
                lut_hbm.at[pl.ds(0, 1), :],
                rowbuf.at[pl.ds(0, 1), :],
                sems.at[bank * k + (t & (k - 1))],
            ).wait()

        def prime(bank, tbase):
            @pl.loop(0, k, step=_UNROLL)
            def _(t0):
                toks = [ids_ref[tbase + t0 + u] for u in range(_UNROLL)]
                for u in range(_UNROLL):
                    start_row(bank, t0 + u, toks[u])

        # First tile of this core's sequential run: nobody primed it for us.
        @pl.when(i == 0)
        def _():
            prime(slot, base)

        # Steady state: keep exactly k row gathers in flight.
        if tile > k:
            @pl.loop(k, tile, step=_UNROLL)
            def _(t0):
                # Read ids from SMEM *before* the DMA waits (.wait() breaks
                # SMEM sst->sld forwarding on the scalar path).
                toks = [ids_ref[base + t0 + u] for u in range(_UNROLL)]
                for u in range(_UNROLL):
                    t = t0 + u
                    wait_row(slot, t)            # row t-k has landed
                    start_row(slot, t, toks[u])

        # Cross-tile double buffering: issue the next tile's first k gathers
        # into the other bank so their latency hides under drain + store.
        @pl.when(i + 1 < tiles_per_split)
        def _():
            prime(nslot, base + tile)

        # Drain the last k outstanding gathers of the current tile.
        @pl.loop(tile - k, tile, step=_UNROLL)
        def _(t0):
            for u in range(_UNROLL):
                wait_row(slot, t0 + u)

        row0 = pl.multiple_of(slot * tile, tile)
        rows = rowbuf[pl.ds(row0, tile), :]
        if bf16_epilogue:
            # bf16-native scale: halves store-epilogue vreg traffic (v6e/v7x).
            out_ref[...] = rows * jnp.asarray(scale, dtype=jnp.bfloat16)
        else:
            out_ref[...] = (rows.astype(jnp.float32) * scale).astype(out_ref.dtype)

    return kernel


# ---------------------------------------------------------------------------
# wrapper (equivalent of Embeddings.forward)
# ---------------------------------------------------------------------------
def embeddings_forward(x, lut, d_model=None, *, token_tile=1024,
                       gather_mode="auto", dma_inflight=32):
    """x: (...,) int token ids; lut: (vocab, d_model); returns (..., d_model)."""
    vocab, dm = lut.shape
    if d_model is None:
        d_model = dm
    assert dm == d_model, "lut feature dim must equal d_model"

    out_dtype = lut.dtype
    itemsize = jnp.dtype(lut.dtype).itemsize
    scale = float(math.sqrt(d_model))
    vmem_cap = _vmem_capacity_bytes()

    # Lane-dense layout: d_model padded to a multiple of 128 (full-width row
    # DMAs, unmasked stores), vocab padded to a multiple of 8.
    dm_p = _round_up(dm, 128)
    vocab_p = _round_up(vocab, 8)
    lut_p = lut
    if (vocab_p, dm_p) != (vocab, dm):
        lut_p = jnp.pad(lut, ((0, vocab_p - vocab), (0, dm_p - dm)))

    lead_shape = x.shape
    # PyTorch nn.Embedding raises on out-of-range ids; here they are clipped.
    ids = jnp.clip(x.reshape(-1).astype(jnp.int32), 0, vocab - 1)
    n = int(ids.shape[0])

    table_bytes = vocab_p * dm_p * itemsize
    if gather_mode == "auto":
        # One-hot path for any table fitting the generation's VMEM budget
        # (~12 MiB v5e/v6e, ~8 MiB v7x), counting a double-buffered table.
        gather_mode = ("onehot"
                       if table_bytes <= min(12 << 20, vmem_cap // 8)
                       else "dma")

    if gather_mode == "onehot":
        per_token = vocab_p * 4 + dm_p * 4 + 2 * dm_p * itemsize + 16
        tile = _choose_token_tile(n, per_token, token_tile, 8 << 20)
        num_tiles = _cdiv(n, tile)
        n_pad = num_tiles * tile
        ids_p = jnp.pad(ids, (0, n_pad - n)) if n_pad != n else ids
        ids_col = ids_p.reshape(n_pad, 1)
        vmem_est = 2 * table_bytes + tile * per_token + (2 << 20)

        def _call(precision):
            return pl.pallas_call(
                _make_onehot_kernel(vocab_p, scale, precision),
                out_shape=jax.ShapeDtypeStruct((n_pad, dm_p), out_dtype),
                grid=(num_tiles,),
                in_specs=[
                    pl.BlockSpec((tile, 1), lambda i: (i, 0)),      # token ids
                    # Constant index map: table fetched from HBM exactly once,
                    # then VMEM-resident across all grid steps.
                    pl.BlockSpec((vocab_p, dm_p), lambda i: (0, 0)),
                ],
                out_specs=pl.BlockSpec((tile, dm_p), lambda i: (i, 0)),
                compiler_params=_compiler_params(("parallel",), vmem_est,
                                                 vmem_cap),
            )(ids_col, lut_p)

        if jnp.dtype(lut.dtype) == jnp.dtype(jnp.float32):
            # HIGHEST keeps the full f32 mantissa through the MXU so the
            # one-hot gather is exact; fall back if the toolchain rejects it.
            try:
                out_pad = _call(jax.lax.Precision.HIGHEST)
            except Exception:
                out_pad = _call(jax.lax.Precision.DEFAULT)
        else:
            out_pad = _call(jax.lax.Precision.DEFAULT)

    elif gather_mode == "dma":
        row_bytes = dm_p * itemsize
        per_token = 4 * dm_p * itemsize + 4 * dm_p + 16
        budget = min(20 << 20, vmem_cap // 3)
        tile = _choose_token_tile(n, per_token, token_tile, budget)
        # In-flight row gathers: throughput ~ k * row_bytes / HBM latency, so
        # scale k with row size (power of two for cheap modular sem indexing).
        k = max(16, min(64, max(int(dma_inflight),
                                (64 << 10) // max(row_bytes, 1))))
        k = _pow2_floor(min(k, tile))

        total_tiles = _cdiv(n, tile)
        n_splits = 2 if total_tiles >= 2 else 1     # v7x: both TensorCores
        tiles_per_split = _cdiv(total_tiles, n_splits)
        n_pad = n_splits * tiles_per_split * tile
        # Pad with a valid id (0) plus one extra tile so next-tile prime reads
        # are always in bounds; padded gathers are discarded by the final slice.
        ids_p = jnp.pad(ids, (0, n_pad + tile - n))

        vmem_est = 4 * tile * dm_p * itemsize + 4 * tile * dm_p + (2 << 20)
        grid_spec = pltpu.PrefetchScalarGridSpec(
            num_scalar_prefetch=1,                   # ids -> SMEM
            grid=(n_splits, tiles_per_split),
            in_specs=[pl.BlockSpec(memory_space=pl.ANY)],   # lut stays in HBM
            out_specs=pl.BlockSpec(
                (tile, dm_p),
                lambda o, i, ids_ref: (o * tiles_per_split + i, 0)),
            scratch_shapes=[
                pltpu.VMEM((2 * tile, dm_p), lut.dtype),    # 2 gather banks
                pltpu.SemaphoreType.DMA((2 * k,)),
            ],
        )
        out_pad = pl.pallas_call(
            _make_dma_gather_kernel(tile, k, tiles_per_split, scale, lut.dtype),
            out_shape=jax.ShapeDtypeStruct((n_pad, dm_p), out_dtype),
            grid_spec=grid_spec,
            compiler_params=_compiler_params(("parallel", "arbitrary"),
                                             vmem_est, vmem_cap),
        )(ids_p, lut_p)

    else:
        raise ValueError(f"unknown gather_mode: {gather_mode!r}")

    return out_pad[:n, :dm].reshape(*lead_shape, dm)


# ---------------------------------------------------------------------------
# self-test
# ---------------------------------------------------------------------------
if __name__ == "__main__":
    key = jax.random.PRNGKey(0)
    k1, k2, k3, k4 = jax.random.split(key, 4)

    # ---- Test A/B: small config (batch=2, seq=8, d_model=128, vocab=32) ----
    d_model, vocab, batch, seq = 128, 32, 2, 8
    lut = jax.random.normal(k1, (vocab, d_model), dtype=jnp.float32)
    x = jax.random.randint(k2, (batch, seq), 0, vocab, dtype=jnp.int32)
    ref = (jnp.take(lut, x.reshape(-1), axis=0).reshape(batch, seq, d_model)
           * math.sqrt(d_model))

    # Auto dispatch -> one-hot MXU path (exact with HIGHEST precision; the
    # tolerance also covers the DEFAULT-precision fallback).
    out_auto = jax.block_until_ready(embeddings_forward(x, lut, d_model))
    assert out_auto.shape == (batch, seq, d_model)
    assert jnp.allclose(out_auto, ref, atol=5e-2, rtol=2e-2), "onehot mismatch"

    # General path (HBM table, in-flight row-gather DMAs) — exact.
    out_dma = jax.block_until_ready(
        embeddings_forward(x, lut, d_model, gather_mode="dma"))
    assert out_dma.shape == (batch, seq, d_model)
    assert jnp.allclose(out_dma, ref, atol=1e-6, rtol=1e-6), "dma mismatch"

    # ---- Test C: multi-tile DMA path (cross-tile double buffering, 2-way
    # parallel split, vocab / d_model padding) — exact. ----------------------
    d2, v2, b2, s2 = 96, 300, 2, 40
    lut2 = jax.random.normal(k3, (v2, d2), dtype=jnp.float32)
    x2 = jax.random.randint(k4, (b2, s2), 0, v2, dtype=jnp.int32)
    ref2 = (jnp.take(lut2, x2.reshape(-1), axis=0).reshape(b2, s2, d2)
            * math.sqrt(d2))
    out2 = jax.block_until_ready(
        embeddings_forward(x2, lut2, d2, token_tile=16, gather_mode="dma"))
    assert out2.shape == (b2, s2, d2)
    assert jnp.allclose(out2, ref2, atol=1e-6, rtol=1e-6), "multi-tile dma mismatch"

    print("KERNEL_OK")
</pallas_src>

<mosaic_0001>
module attributes {stable_mosaic.version = 11 : i64} {
  func.func @kernel(%arg0: i32, %arg1: memref<16x1xi32, #tpu.memory_space<vmem>>, %arg2: memref<32x128xf32, #tpu.memory_space<vmem>>, %arg3: memref<16x128xf32, #tpu.memory_space<vmem>>) attributes {dimension_semantics = [#tpu.dimension_semantics<parallel>], iteration_bounds = array<i64: 1>, scalar_prefetch = 0 : i64, scratch_operands = 0 : i64, tpu.core_type = #tpu.core_type<tc>, window_params = [{transform_indices = @transform_0, window_bounds = array<i64: 16, 1>}, {pipeline_mode = #tpu.pipeline_mode<synchronous>, transform_indices = @transform_1, window_bounds = array<i64: 32, 128>}, {transform_indices = @transform_2, window_bounds = array<i64: 16, 128>}]} {
    %c0 = arith.constant 0 : index
    %c0_0 = arith.constant 0 : index
    %0 = vector.load %arg1[%c0, %c0_0] : memref<16x1xi32, #tpu.memory_space<vmem>>, vector<16x1xi32>
    %1 = tpu.iota {dimensions = array<i32: 1>} : vector<16x32xi32>
    %2 = vector.broadcast %0 : vector<16x1xi32> to vector<16x32xi32>
    %3 = arith.cmpi eq, %2, %1 : vector<16x32xi32>
    %4 = arith.extui %3 : vector<16x32xi1> to vector<16x32xi32>
    %5 = arith.sitofp %4 : vector<16x32xi32> to vector<16x32xf32>
    %c0_1 = arith.constant 0 : index
    %c0_2 = arith.constant 0 : index
    %6 = vector.load %arg2[%c0_1, %c0_2] : memref<32x128xf32, #tpu.memory_space<vmem>>, vector<32x128xf32>
    %cst = arith.constant dense<0.000000e+00> : vector<16x128xf32>
    %7 = tpu.matmul %5, %6, %cst {dimension_numbers = #tpu.dot_dimension_numbers<[1], [0], [0], [1], [0, 0, 1, 1], [], []>, precision = #tpu.contract_precision<fp32>} : vector<16x32xf32>, vector<32x128xf32>, vector<16x128xf32> -> vector<16x128xf32>
    %cst_3 = arith.constant 11.3137083 : f32
    %8 = vector.broadcast %cst_3 : f32 to vector<16x128xf32>
    %9 = arith.mulf %7, %8 : vector<16x128xf32>
    %c0_4 = arith.constant 0 : index
    %c0_5 = arith.constant 0 : index
    %10 = vector.load %arg3[%c0_4, %c0_5] : memref<16x128xf32, #tpu.memory_space<vmem>>, vector<16x128xf32>
    tpu.vector_store %arg3[%c0_4, %c0_5], %9 {strides = array<i32>} : memref<16x128xf32, #tpu.memory_space<vmem>>, vector<16x128xf32>,
    return
  }
  func.func @transform_0(%arg0: i32) -> (i32, i32) {
    %c0_i32 = arith.constant 0 : i32
    %c0_i32_0 = arith.constant 0 : i32
    return %arg0, %c0_i32 : i32, i32
  }
  func.func @transform_1(%arg0: i32) -> (i32, i32) {
    %c0_i32 = arith.constant 0 : i32
    %c0_i32_0 = arith.constant 0 : i32
    %c0_i32_1 = arith.constant 0 : i32
    return %c0_i32, %c0_i32_0 : i32, i32
  }
  func.func @transform_2(%arg0: i32) -> (i32, i32) {
    %c0_i32 = arith.constant 0 : i32
    %c0_i32_0 = arith.constant 0 : i32
    return %arg0, %c0_i32 : i32, i32
  }
}

module attributes {stable_mosaic.version = 11 : i64} {
  func.func @kernel(%arg0: i32, %arg1: memref<16x1xi32, #tpu.memory_space<vmem>>, %arg2: memref<32x128xf32, #tpu.memory_space<vmem>>, %arg3: memref<16x128xf32, #tpu.memory_space<vmem>>) attributes {dimension_semantics = [#tpu.dimension_semantics<parallel>], iteration_bounds = array<i64: 1>, scalar_prefetch = 0 : i64, scratch_operands = 0 : i64, tpu.core_type = #tpu.core_type<tc>, window_params = [{transform_indices = @transform_0, window_bounds = array<i64: 16, 1>}, {pipeline_mode = #tpu.pipeline_mode<synchronous>, transform_indices = @transform_1, window_bounds = array<i64: 32, 128>}, {transform_indices = @transform_2, window_bounds = array<i64: 16, 128>}]} {
    %c0 = arith.constant 0 : index
    %c0_0 = arith.constant 0 : index
    %0 = vector.load %arg1[%c0, %c0_0] : memref<16x1xi32, #tpu.memory_space<vmem>>, vector<16x1xi32>
    %1 = tpu.iota {dimensions = array<i32: 1>} : vector<16x32xi32>
    %2 = vector.broadcast %0 : vector<16x1xi32> to vector<16x32xi32>
    %3 = arith.cmpi eq, %2, %1 : vector<16x32xi32>
    %4 = arith.extui %3 : vector<16x32xi1> to vector<16x32xi32>
    %5 = arith.sitofp %4 : vector<16x32xi32> to vector<16x32xf32>
    %c0_1 = arith.constant 0 : index
    %c0_2 = arith.constant 0 : index
    %6 = vector.load %arg2[%c0_1, %c0_2] : memref<32x128xf32, #tpu.memory_space<vmem>>, vector<32x128xf32>
    %cst = arith.constant dense<0.000000e+00> : vector<16x128xf32>
    %7 = tpu.matmul %5, %6, %cst {dimension_numbers = #tpu.dot_dimension_numbers<[1], [0], [0], [1], [0, 0, 1, 1], [], []>} : vector<16x32xf32>, vector<32x128xf32>, vector<16x128xf32> -> vector<16x128xf32>
    %cst_3 = arith.constant 11.3137083 : f32
    %8 = vector.broadcast %cst_3 : f32 to vector<16x128xf32>
    %9 = arith.mulf %7, %8 : vector<16x128xf32>
    %c0_4 = arith.constant 0 : index
    %c0_5 = arith.constant 0 : index
    %10 = vector.load %arg3[%c0_4, %c0_5] : memref<16x128xf32, #tpu.memory_space<vmem>>, vector<16x128xf32>
    tpu.vector_store %arg3[%c0_4, %c0_5], %9 {strides = array<i32>} : memref<16x128xf32, #tpu.memory_space<vmem>>, vector<16x128xf32>,
    return
  }
  func.func @transform_0(%arg0: i32) -> (i32, i32) {
    %c0_i32 = arith.constant 0 : i32
    %c0_i32_0 = arith.constant 0 : i32
    return %arg0, %c0_i32 : i32, i32
  }
  func.func @transform_1(%arg0: i32) -> (i32, i32) {
    %c0_i32 = arith.constant 0 : i32
    %c0_i32_0 = arith.constant 0 : i32
    %c0_i32_1 = arith.constant 0 : i32
    return %c0_i32, %c0_i32_0 : i32, i32
  }
  func.func @transform_2(%arg0: i32) -> (i32, i32) {
    %c0_i32 = arith.constant 0 : i32
    %c0_i32_0 = arith.constant 0 : i32
    return %arg0, %c0_i32 : i32, i32
  }
}

</mosaic_0001>

<bundles_post_ra>
// kernel: tpu_custom_call.1
= control target key start
LH: loop header
LB: loop body
LE: loop exit
PB: predicated region body
PF: predicated region fallthrough
CT: control target
= control target key end

     0   :  { %7 = vsyncpa [#allocation3], 0  ;;  %s416_s0 = inlined_call_operand.vmem [shape: s32[16,1], index: 0, kind: input, shape index: {}]   ;;  %s417_s1 = inlined_call_operand.hbm [shape: f32[32,128], index: 1, kind: input, shape index: {}]   ;;  %s418_s2 = inlined_call_operand.hbm [shape: f32[16,128], index: 2, kind: output, shape index: {}]  }
   0x1   :  { %8 = vsyncpa [#allocation4], 0  ;;  %s15_s11 = sshll.u32 %s417_s1, 4  ;;  %s369_s12 = smov [#allocation2]   ;;  %s16_s11 = int_to_ptr.hbm [resolvable:$true] %s15_s11 }
   0x2   :  { %s17_s13 = sshll.u32 %s369_s12, 4  ;;  %s370_s14 = smov 128   ;;  %s18_s13 = int_to_ptr.vmem [resolvable:$true] %s17_s13 }
   0x3   :  { %s371_s15 = smov 8  }
   0x4   :  { %23 = dma.hbm_to_vmem [thread:$0]  %s16_s11, 512, %s18_s13, [#allocation3], %s370_s14, %s370_s14, %s371_s15  }
   0x5   :  { %365 = dma.done.wait [#allocation3], 512  }
   0x6   :  { %366 = vsyncadd [#allocation3], 4294966784  ;;  %v372_v0 = vmov 0   ;;  %v29_v1 = vld [vmem:[%s416_s0 + $0x8] sm:$0xff]  ;;  %v47_v2 = vld [vmem:[#allocation2 + $0x18] sm:$0xff]  ;;  %v30_v27 = vlaneseq  ;;  %vm48_vm0 = vcmask 261120  }
   0x7   :  { %316 = vset.pattern.permute.xlu0 %v372_v0  ;;  %v67_v3 = vand.u32 4294901760, %v47_v2  ;;  %v46_v4 = vld [vmem:[#allocation2 + $0x10] sm:$0xff]  ;;  %v45_v5 = vld [vmem:[#allocation2 + $0x8] sm:$0xff]  ;;  %v28_v12 = vld [vmem:[%s416_s0] sm:$0xff]  ;;  %v373_v30 = vmov 0.0   ;;  %s374_s0 = smov [#allocation5]  }
   0x8   :  { %36 = vperm.xlu0 %316, %v29_v1   ;;  %v69_v6 = vand.u32 4294901760, %v46_v4  ;;  %v71_v7 = vand.u32 4294901760, %v45_v5  ;;  %v44_v21 = vld [vmem:[#allocation2] sm:$0xff]  ;;  %v31_v28 = vand.u32 127, %v30_v27  ;;  %s279_s19 = sshll.u32 %s374_s0, 4  ;;  %s281_s22 = sshll.u32 %s418_s2, 4  ;;  %s280_s19 = int_to_ptr.vmem [resolvable:$true] %s279_s19  ;;  %s282_s22 = int_to_ptr.hbm [resolvable:$true] %s281_s22 }
   0x9   :  { %v105_v8 = vsub.f32 %v47_v2, %v67_v3  ;;  %302 = vmatpush.msra.mxu2 %v67_v3  ;;  %68 = vmatpush.msra.mxu0 %v67_v3  ;;  %v73_v22 = vand.u32 4294901760, %v44_v21 }
   0xa   :  { %v111_v9 = vsub.f32 %v46_v4, %v69_v6  ;;  %v117_v10 = vsub.f32 %v45_v5, %v71_v7 }
   0xb   :  { %v106_v11 = vand.u32 4294901760, %v105_v8  ;;  %303 = vmatpush.msra.mxu2 %v69_v6  ;;  %70 = vmatpush.msra.mxu0 %v69_v6  ;;  %v123_v23 = vsub.f32 %v44_v21, %v73_v22 }
   0xc   :  { %v112_v13 = vand.u32 4294901760, %v111_v9  ;;  %v118_v14 = vand.u32 4294901760, %v117_v10 }
   0xd   :  { %v107_v15 = vsub.f32 %v105_v8, %v106_v11  ;;  %304 = vmatpush.msra.mxu2 %v71_v7  ;;  %72 = vmatpush.msra.mxu0 %v71_v7  ;;  %v124_v24 = vand.u32 4294901760, %v123_v23 }
   0xe   :  { %v113_v16 = vsub.f32 %v111_v9, %v112_v13  ;;  %v119_v17 = vsub.f32 %v117_v10, %v118_v14 }
   0xf   :  { %v108_v18 = vand.u32 4294901760, %v107_v15  ;;  %305 = vmatpush.msra.mxu2 %v73_v22  ;;  %74 = vmatpush.msra.mxu0 %v73_v22  ;;  %v125_v25 = vsub.f32 %v123_v23, %v124_v24 }
  0x10   :  { %33 = vperm.xlu0 %316, %v28_v12   ;;  %v114_v19 = vand.u32 4294901760, %v113_v16  ;;  %v120_v20 = vand.u32 4294901760, %v119_v17 }
  0x11   :  { %306 = vmatpush.msra.mxu3 %v108_v18  ;;  %109 = vmatpush.msra.mxu1 %v108_v18  ;;  %v126_v26 = vand.u32 4294901760, %v125_v25 }
  0x12   :  { %151 = vmatpush.msrb.mxu2 %v105_v8  ;;  %220 = vmatpush.msrb.mxu0 %v106_v11 }
  0x13   :  { %307 = vmatpush.msra.mxu3 %v114_v19  ;;  %115 = vmatpush.msra.mxu1 %v114_v19 }
  0x14   :  { %154 = vmatpush.msrb.mxu2 %v111_v9  ;;  %224 = vmatpush.msrb.mxu0 %v112_v13 }
  0x15   :  { %308 = vmatpush.msra.mxu3 %v120_v20  ;;  %121 = vmatpush.msra.mxu1 %v120_v20 }
  0x16   :  { %157 = vmatpush.msrb.mxu2 %v117_v10  ;;  %228 = vmatpush.msrb.mxu0 %v118_v14 }
  0x17   :  { %309 = vmatpush.msra.mxu3 %v126_v26  ;;  %127 = vmatpush.msra.mxu1 %v126_v26 }
  0x18   :  { %160 = vmatpush.msrb.mxu2 %v123_v23  ;;  %232 = vmatpush.msrb.mxu0 %v124_v24 }
  0x19   :  { %185 = vmatpush.msrb.mxu3 %v67_v3  ;;  %255 = vmatpush.msrb.mxu1 %v67_v3 }
  0x1b   :  { %187 = vmatpush.msrb.mxu3 %v69_v6  ;;  %257 = vmatpush.msrb.mxu1 %v69_v6 }
  0x1d   :  { %189 = vmatpush.msrb.mxu3 %v71_v7  ;;  %259 = vmatpush.msrb.mxu1 %v71_v7 }
  0x1f   :  { %191 = vmatpush.msrb.mxu3 %v73_v22  ;;  %261 = vmatpush.msrb.mxu1 %v73_v22 }
  0x7a   :  { %v37_v29 = vpop.permute.xlu0 %36 }
  0x7b   :  { %vm39_vm1 = vcmp.eq.s32.totalorder %v37_v29, %v31_v28 }
  0x7c   :  { %v295_v31 = vsel %vm39_vm1, 1.0, %v373_v30 }
  0x7d   :  { %v53_v32 = vsel %vm48_vm0, %v295_v31, 0  ;;  %297 = vmatmul.msk.f32.vlgmr.msra.gmra.mxu3 %vm48_vm0, %v295_v31 }
  0x7e   :  { %v84_v33 = vsub.f32 %v53_v32, %v53_v32 }
  0x80   :  { %v85_v34 = vand.u32 4294901760, %v84_v33 }
  0x82   :  { %v34_v35 = vpop.permute.xlu0 %33  ;;  %v86_v36 = vsub.f32 %v84_v33, %v85_v34 }
  0x83   :  { %vm38_vm2 = vcmp.eq.s32.totalorder %v34_v35, %v31_v28 }
  0x84   :  { %v294_v37 = vsel %vm38_vm2, 1.0, %v373_v30  ;;  %v87_v38 = vand.u32 4294901760, %v86_v36 }
  0x85   :  { %v50_v39 = vsel %vm48_vm0, %v294_v37, 0  ;;  %296 = vmatmul.msk.f32.vlgmr.msra.gmra.mxu1 %vm48_vm0, %v294_v37 }
  0x86   :  { %v76_v40 = vsub.f32 %v50_v39, %v50_v39  ;;  %88 = vmatmul.f32.vlgmr.msra.gmra.mxu2 %v87_v38 }
  0x88   :  { %v77_v41 = vand.u32 4294901760, %v76_v40 }
  0x8a   :  { %195 = vmatmul.f32.vlgmr.msrb.gmra.mxu3 %v77_v41  ;;  %v78_v42 = vsub.f32 %v76_v40, %v77_v41 }
  0x8c   :  { %v79_v43 = vand.u32 4294901760, %v78_v42 }
  0x8d   :  { %300 = vmatmul.msk.f32.vlgmr.msrb.gmra.mxu1 %vm48_vm0, %v294_v37 }
  0x8e   :  { %80 = vmatmul.f32.vlgmr.msra.gmra.mxu0 %v79_v43  ;;  %163 = vmatmul.f32.vlgmr.msrb.gmra.mxu2 %v76_v40 }
  0x92   :  { %201 = vmatmul.f32.gmra.mxu3 %v85_v34 }
  0x95   :  { %301 = vmatmul.msk.f32.gmra.mxu1 %vm48_vm0, %v295_v31 }
  0x96   :  { %168 = vmatmul.f32.gmra.mxu2 %v84_v33  ;;  %298 = vmatmul.msk.f32.vlgmr.msrb.gmra.mxu0 %vm48_vm0, %v294_v37 }
  0x9e   :  { %299 = vmatmul.msk.f32.gmra.mxu0 %vm48_vm0, %v295_v31 }
 0x100   :  { %v134_v44 = vpop.f32.mrf.mxu3 }
 0x102   :  { %v130_v46 = vpop.f32.mrf.mxu1 }
 0x109   :  { %v89_v45 = vpop.f32.mrf.mxu2 }
 0x10a   :  { %v264_v54 = vpop.f32.mrf.mxu1  ;;  %v135_v56 = vadd.f32 %v134_v44, %v89_v45 }
 0x10b   :  { %v81_v47 = vpop.f32.mrf.mxu0 }
 0x10c   :  { %v131_v48 = vadd.f32 %v130_v46, %v81_v47 }
 0x10d   :  { %v196_v49 = vpop.f32.mrf.mxu3 }
 0x111   :  { %v164_v50 = vpop.f32.mrf.mxu2 }
 0x112   :  { %v165_v51 = vadd.f32 %v164_v50, %v131_v48  ;;  %v268_v1 = vpop.f32.mrf.mxu1 }
 0x113   :  { %v235_v52 = vpop.f32.mrf.mxu0 }
 0x114   :  { %v197_v53 = vadd.f32 %v196_v49, %v165_v51 }
 0x115   :  { %v202_v61 = vpop.f32.mrf.mxu3 }
 0x116   :  { %v236_v55 = vadd.f32 %v235_v52, %v197_v53 }
 0x118   :  { %v265_v57 = vadd.f32 %v264_v54, %v236_v55 }
 0x119   :  { %v169_v58 = vpop.f32.mrf.mxu2 }
 0x11a   :  { %v271_v59 = vmul.f32 11.313708, %v265_v57  ;;  %v170_v60 = vadd.f32 %v169_v58, %v135_v56 }
 0x11b   :  { %v239_v63 = vpop.f32.mrf.mxu0 }
 0x11c   :  { %273 = vst [vmem:[#allocation5] sm:$0xff] %v271_v59  ;;  %v203_v62 = vadd.f32 %v202_v61, %v170_v60 }
 0x11e   :  { %v240_v0 = vadd.f32 %v239_v63, %v203_v62 }
 0x120   :  { %v269_v2 = vadd.f32 %v268_v1, %v240_v0 }
 0x122   :  { %v272_v3 = vmul.f32 11.313708, %v269_v2 }
 0x124   :  { %274 = vst [vmem:[#allocation5 + $0x8] sm:$0xff] %v272_v3 }
 0x125   :  { %287 = dma.vmem_to_hbm [thread:$0]  %s280_s19, 256, %s282_s22, [#allocation4], %s370_s14, %s370_s14, %s371_s15  }
 0x126   :  { %367 = dma.done.wait [#allocation4], 256  }
 0x127   :  { %368 = vsyncadd [#allocation4], 4294967040 }
 0x128   :  { %292 = vsyncpa [#allocation3], 1 }
 0x129   :  { %293 = vsyncpa [#allocation4], 1 }

// kernel: tpu_custom_call.1
= control target key start
LH: loop header
LB: loop body
LE: loop exit
PB: predicated region body
PF: predicated region fallthrough
CT: control target
= control target key end

     0   :  { %7 = vsyncpa [#allocation3], 0  ;;  %s207_s0 = inlined_call_operand.vmem [shape: s32[16,1], index: 0, kind: input, shape index: {}]   ;;  %s208_s1 = inlined_call_operand.hbm [shape: f32[32,128], index: 1, kind: input, shape index: {}]   ;;  %s209_s2 = inlined_call_operand.hbm [shape: f32[16,128], index: 2, kind: output, shape index: {}]  }
   0x1   :  { %8 = vsyncpa [#allocation4], 0  ;;  %s15_s11 = sshll.u32 %s208_s1, 4  ;;  %s168_s12 = smov [#allocation2]   ;;  %s16_s11 = int_to_ptr.hbm [resolvable:$true] %s15_s11 }
   0x2   :  { %s17_s13 = sshll.u32 %s168_s12, 4  ;;  %s169_s14 = smov 128   ;;  %s18_s13 = int_to_ptr.vmem [resolvable:$true] %s17_s13 }
   0x3   :  { %s170_s15 = smov 8  }
   0x4   :  { %23 = dma.hbm_to_vmem [thread:$0]  %s16_s11, 512, %s18_s13, [#allocation3], %s169_s14, %s169_s14, %s170_s15  }
   0x5   :  { %164 = dma.done.wait [#allocation3], 512  }
   0x6   :  { %165 = vsyncadd [#allocation3], 4294966784  ;;  %v171_v0 = vmov 0   ;;  %v28_v1 = vld [vmem:[%s207_s0] sm:$0xff]  ;;  %v47_v2 = vld [vmem:[#allocation2 + $0x18] sm:$0xff]  ;;  %v30_v7 = vlaneseq  ;;  %vm48_vm0 = vcmask 261120  }
   0x7   :  { %115 = vset.pattern.permute.xlu0 %v171_v0  ;;  %67 = vmatpush.msra.mxu0 %v47_v2  ;;  %v46_v3 = vld [vmem:[#allocation2 + $0x10] sm:$0xff]  ;;  %v45_v4 = vld [vmem:[#allocation2 + $0x8] sm:$0xff]  ;;  %v44_v6 = vld [vmem:[#allocation2] sm:$0xff]  ;;  %v172_v10 = vmov 0.0   ;;  %s88_s22 = sshll.u32 %s209_s2, 4  ;;  %s89_s22 = int_to_ptr.hbm [resolvable:$true] %s88_s22 }
   0x8   :  { %33 = vperm.xlu0 %115, %v28_v1   ;;  %105 = vmatpush.msra.mxu1 %v47_v2  ;;  %v29_v5 = vld [vmem:[%s207_s0 + $0x8] sm:$0xff]  ;;  %v31_v8 = vand.u32 127, %v30_v7  ;;  %s173_s0 = smov [#allocation5]  }
   0x9   :  { %68 = vmatpush.msra.mxu0 %v46_v3  ;;  %s86_s19 = sshll.u32 %s173_s0, 4  ;;  %s87_s19 = int_to_ptr.vmem [resolvable:$true] %s86_s19 }
   0xa   :  { %106 = vmatpush.msra.mxu1 %v46_v3 }
   0xb   :  { %69 = vmatpush.msra.mxu0 %v45_v4 }
   0xc   :  { %107 = vmatpush.msra.mxu1 %v45_v4 }
   0xd   :  { %70 = vmatpush.msra.mxu0 %v44_v6 }
   0xe   :  { %108 = vmatpush.msra.mxu1 %v44_v6 }
  0x10   :  { %36 = vperm.xlu0 %115, %v29_v5  }
  0x7a   :  { %v34_v9 = vpop.permute.xlu0 %33 }
  0x7b   :  { %vm38_vm1 = vcmp.eq.s32.totalorder %v34_v9, %v31_v8 }
  0x7c   :  { %v101_v11 = vsel %vm38_vm1, 1.0, %v172_v10 }
  0x7d   :  { %103 = vmatmul.msk.f32.vlgmr.msra.gmra.mxu0 %vm48_vm0, %v101_v11 }
  0x82   :  { %v37_v12 = vpop.permute.xlu0 %36 }
  0x83   :  { %vm39_vm2 = vcmp.eq.s32.totalorder %v37_v12, %v31_v8 }
  0x84   :  { %v102_v13 = vsel %vm39_vm2, 1.0, %v172_v10 }
  0x85   :  { %104 = vmatmul.msk.f32.vlgmr.msra.gmra.mxu1 %vm48_vm0, %v102_v13 }
  0xfa   :  { %v72_v14 = vpop.f32.mrf.mxu0 }
  0xfb   :  { %v78_v15 = vmul.f32 11.313708, %v72_v14 }
  0xfd   :  { %80 = vst [vmem:[#allocation5] sm:$0xff] %v78_v15 }
 0x102   :  { %v75_v16 = vpop.f32.mrf.mxu1 }
 0x103   :  { %v79_v17 = vmul.f32 11.313708, %v75_v16 }
 0x105   :  { %81 = vst [vmem:[#allocation5 + $0x8] sm:$0xff] %v79_v17 }
 0x106   :  { %94 = dma.vmem_to_hbm [thread:$0]  %s87_s19, 256, %s89_s22, [#allocation4], %s169_s14, %s169_s14, %s170_s15  }
 0x107   :  { %166 = dma.done.wait [#allocation4], 256  }
 0x108   :  { %167 = vsyncadd [#allocation4], 4294967040 }
 0x109   :  { %99 = vsyncpa [#allocation3], 1 }
 0x10a   :  { %100 = vsyncpa [#allocation4], 1 }

</bundles_post_ra>
